<compile_context>
chip_gen: v6e
topology: v6e:2x2x1
jax: 0.10.0
libtpu: 0.0.40
codegen_flags: <defaults>
</compile_context>

<pallas_src>
import functools

import numpy as np
import jax
import jax.numpy as jnp
from jax.experimental import pallas as pl
from jax.experimental.pallas import tpu as pltpu


def _round_up(x, m):
    return (x + m - 1) // m * m


_NEG = -3.0e38  # "minus infinity" pad for max pooling (bf16-representable, finite)


def _pad2(x, R, C):
    r, c = x.shape
    if r == R and c == C:
        return x
    return jnp.pad(x, ((0, R - r), (0, C - c)))


def _row_tile(n, cap=1024):
    """Largest divisor of n that is a multiple of 8 and <= cap (else n itself)."""
    if n % 8 != 0 or n <= cap:
        return n
    t = cap - (cap % 8)
    while n % t:
        t -= 8
    return t


# ---------------------------------------------------------------------------
# Pallas kernels
# ---------------------------------------------------------------------------
def _mm_epilogue_kernel(a_ref, b_ref, s_ref, t_ref, o_ref, acc_ref, *, relu):
    """acc += a @ b ; on last k-step: out = act(acc * scale + shift)."""
    @pl.when(pl.program_id(2) == 0)
    def _():
        acc_ref[...] = jnp.zeros_like(acc_ref)

    acc_ref[...] += jnp.dot(a_ref[...], b_ref[...],
                            preferred_element_type=jnp.float32)

    @pl.when(pl.program_id(2) == pl.num_programs(2) - 1)
    def _():
        y = acc_ref[...] * s_ref[...] + t_ref[...]
        if relu:
            y = jnp.maximum(y, 0.0)
        o_ref[...] = y.astype(o_ref.dtype)


def _se_head_kernel(x_ref, w1_ref, b1_ref, w2_ref, b2_ref, o_ref, *, inv_hw):
    """GAP over HW -> fc1 -> ReLU -> fc2 (gate logits), one image per grid step."""
    pooled = jnp.sum(x_ref[0].astype(jnp.float32), axis=0, keepdims=True) * inv_hw
    p8 = jnp.broadcast_to(pooled, (8, pooled.shape[1])).astype(jnp.bfloat16)
    h = jnp.dot(p8, w1_ref[...], preferred_element_type=jnp.float32) + b1_ref[...]
    h = jnp.maximum(h, 0.0)
    g = jnp.dot(h.astype(jnp.bfloat16), w2_ref[...],
                preferred_element_type=jnp.float32) + b2_ref[...]
    o_ref[...] = g[0:1][None]


def _gap_linear_kernel(x_ref, w_ref, b_ref, o_ref, *, inv_hw):
    """Global average pool + final linear classifier, one image per grid step."""
    pooled = jnp.sum(x_ref[0].astype(jnp.float32), axis=0, keepdims=True) * inv_hw
    p8 = jnp.broadcast_to(pooled, (8, pooled.shape[1])).astype(jnp.bfloat16)
    y = jnp.dot(p8, w_ref[...], preferred_element_type=jnp.float32) + b_ref[...]
    o_ref[...] = y[0:1][None]


def _se_apply_kernel(x_ref, g_ref, r_ref, o_ref):
    """relu(x * sigmoid(gate) + residual); gate broadcast over the HW tile."""
    gate = jax.nn.sigmoid(g_ref[...].astype(jnp.float32))
    y = x_ref[...].astype(jnp.float32) * gate + r_ref[...].astype(jnp.float32)
    o_ref[...] = jnp.maximum(y, 0.0).astype(o_ref.dtype)


def _window_max_kernel(x_ref, o_ref):
    o_ref[...] = jnp.max(x_ref[...], axis=1)


def _add_kernel(a_ref, b_ref, o_ref):
    o_ref[...] = a_ref[...] + b_ref[...]


# ---------------------------------------------------------------------------
# Kernel wrappers
# ---------------------------------------------------------------------------
@functools.partial(jax.jit, static_argnames=("relu",))
def matmul_affine(a, b, scale, shift, *, relu=False):
    """act((a @ b) * scale + shift); a:[M,K], b:[K,N], scale/shift:[N]. bf16 MXU."""
    M, K = a.shape
    K2, N = b.shape
    assert K == K2
    # tiles: big enough to feed the MXU, padded arrays tile exactly.
    bm = _round_up(M, 8) if M <= 256 else 256
    Mp = _round_up(M, bm)
    Kp = _round_up(K, 128)
    bk = min(512, Kp)
    while Kp % bk:
        bk -= 128
    Np = _round_up(N, 128)
    bn = min(256, Np)
    while Np % bn:
        bn -= 128

    a_p = _pad2(a.astype(jnp.bfloat16), Mp, Kp)
    b_p = _pad2(b.astype(jnp.bfloat16), Kp, Np)
    s_p = _pad2(scale.reshape(1, -1).astype(jnp.float32), 1, Np)
    t_p = _pad2(shift.reshape(1, -1).astype(jnp.float32), 1, Np)

    out = pl.pallas_call(
        functools.partial(_mm_epilogue_kernel, relu=relu),
        out_shape=jax.ShapeDtypeStruct((Mp, Np), jnp.bfloat16),
        grid_spec=pltpu.PrefetchScalarGridSpec(
            num_scalar_prefetch=0,
            grid=(Mp // bm, Np // bn, Kp // bk),
            in_specs=[pl.BlockSpec((bm, bk), lambda i, j, k: (i, k)),
                      pl.BlockSpec((bk, bn), lambda i, j, k: (k, j)),
                      pl.BlockSpec((1, bn), lambda i, j, k: (0, j)),
                      pl.BlockSpec((1, bn), lambda i, j, k: (0, j))],
            out_specs=pl.BlockSpec((bm, bn), lambda i, j, k: (i, j)),
            scratch_shapes=[pltpu.VMEM((bm, bn), jnp.float32)],
        ),
        compiler_params=pltpu.CompilerParams(
            dimension_semantics=("parallel", "parallel", "arbitrary")),
    )(a_p, b_p, s_p, t_p)
    return out[:M, :N]


@functools.partial(jax.jit, static_argnames=("relu",))
def grouped_matmul_affine(a, b_packed, scale, shift, *, relu=True):
    """Grouped 3x3 conv as a packed matmul.

    a        : [M, n_packs * Kpp] channel-major im2col patches
    b_packed : [n_packs, Kpp, L]  block-diagonal-within-pack weights (L=128 lanes)
    The grid's pack axis restricts each 128-lane output tile to its own 128 input
    channels, so FLOPs/weight bytes scale with width*128 instead of width*width.
    """
    M, Ktot = a.shape
    n_packs, Kpp, L = b_packed.shape
    assert Ktot == n_packs * Kpp

    bm = _round_up(M, 8) if M <= 256 else 256
    Mp = _round_up(M, bm)
    a_p = _pad2(a.astype(jnp.bfloat16), Mp, Ktot)
    s_p = scale.reshape(1, -1).astype(jnp.float32)
    t_p = shift.reshape(1, -1).astype(jnp.float32)

    out = pl.pallas_call(
        functools.partial(_mm_epilogue_kernel, relu=relu),
        out_shape=jax.ShapeDtypeStruct((Mp, n_packs * L), jnp.bfloat16),
        grid_spec=pltpu.PrefetchScalarGridSpec(
            num_scalar_prefetch=0,
            grid=(Mp // bm, n_packs, 1),
            in_specs=[pl.BlockSpec((bm, Kpp), lambda i, p, k: (i, p)),
                      pl.BlockSpec((None, Kpp, L), lambda i, p, k: (p, 0, 0)),
                      pl.BlockSpec((1, L), lambda i, p, k: (0, p)),
                      pl.BlockSpec((1, L), lambda i, p, k: (0, p))],
            out_specs=pl.BlockSpec((bm, L), lambda i, p, k: (i, p)),
            scratch_shapes=[pltpu.VMEM((bm, L), jnp.float32)],
        ),
        compiler_params=pltpu.CompilerParams(
            dimension_semantics=("parallel", "parallel", "arbitrary")),
    )(a_p, b_packed, s_p, t_p)
    return out[:M, :]


@jax.jit
def se_head(x3d, w1, b1, w2, b2):
    """x3d: [N, HW, C] -> gate logits [N, 1, C] (GAP+fc1+ReLU+fc2 fused)."""
    N, HW, C = x3d.shape
    mid = w1.shape[1]
    return pl.pallas_call(
        functools.partial(_se_head_kernel, inv_hw=1.0 / float(HW)),
        out_shape=jax.ShapeDtypeStruct((N, 1, C), jnp.float32),
        grid_spec=pltpu.PrefetchScalarGridSpec(
            num_scalar_prefetch=0, grid=(N,),
            in_specs=[pl.BlockSpec((1, HW, C), lambda n: (n, 0, 0)),
                      pl.BlockSpec((C, mid), lambda n: (0, 0)),
                      pl.BlockSpec((1, mid), lambda n: (0, 0)),
                      pl.BlockSpec((mid, C), lambda n: (0, 0)),
                      pl.BlockSpec((1, C), lambda n: (0, 0))],
            out_specs=pl.BlockSpec((1, 1, C), lambda n: (n, 0, 0)),
        ),
        compiler_params=pltpu.CompilerParams(dimension_semantics=("parallel",)),
    )(x3d, w1, b1, w2, b2)


@jax.jit
def gap_linear(x3d, w, b):
    """x3d: [N, HW, C] -> logits [N, w.shape[1]] (GAP + classifier fused)."""
    N, HW, C = x3d.shape
    No = w.shape[1]
    out = pl.pallas_call(
        functools.partial(_gap_linear_kernel, inv_hw=1.0 / float(HW)),
        out_shape=jax.ShapeDtypeStruct((N, 1, No), jnp.float32),
        grid_spec=pltpu.PrefetchScalarGridSpec(
            num_scalar_prefetch=0, grid=(N,),
            in_specs=[pl.BlockSpec((1, HW, C), lambda n: (n, 0, 0)),
                      pl.BlockSpec((C, No), lambda n: (0, 0)),
                      pl.BlockSpec((1, No), lambda n: (0, 0))],
            out_specs=pl.BlockSpec((1, 1, No), lambda n: (n, 0, 0)),
        ),
        compiler_params=pltpu.CompilerParams(dimension_semantics=("parallel",)),
    )(x3d, w, b)
    return out[:, 0, :]


@jax.jit
def se_scale_residual_relu(x3d, gate3d, res3d):
    """relu(x * sigmoid(gate) + residual); x/res: [N, HW, C], gate: [N, 1, C]."""
    N, HW, C = x3d.shape
    hw_t = _row_tile(HW)
    return pl.pallas_call(
        _se_apply_kernel,
        out_shape=jax.ShapeDtypeStruct((N, HW, C), jnp.bfloat16),
        grid_spec=pltpu.PrefetchScalarGridSpec(
            num_scalar_prefetch=0, grid=(N, HW // hw_t),
            in_specs=[pl.BlockSpec((1, hw_t, C), lambda n, r: (n, r, 0)),
                      pl.BlockSpec((1, 1, C), lambda n, r: (n, 0, 0)),
                      pl.BlockSpec((1, hw_t, C), lambda n, r: (n, r, 0))],
            out_specs=pl.BlockSpec((1, hw_t, C), lambda n, r: (n, r, 0)),
        ),
        compiler_params=pltpu.CompilerParams(
            dimension_semantics=("parallel", "parallel")),
    )(x3d, gate3d, res3d)


@jax.jit
def window_max(patches):
    """patches: [R, KK, C] -> [R, C] max over the window axis."""
    R, KK, C = patches.shape
    rt = _row_tile(R)
    return pl.pallas_call(
        _window_max_kernel,
        out_shape=jax.ShapeDtypeStruct((R, C), jnp.bfloat16),
        grid_spec=pltpu.PrefetchScalarGridSpec(
            num_scalar_prefetch=0, grid=(R // rt,),
            in_specs=[pl.BlockSpec((rt, KK, C), lambda i: (i, 0, 0))],
            out_specs=pl.BlockSpec((rt, C), lambda i: (i, 0)),
        ),
        compiler_params=pltpu.CompilerParams(dimension_semantics=("parallel",)),
    )(patches)


@jax.jit
def pallas_add(a, b):
    return pl.pallas_call(
        _add_kernel, out_shape=jax.ShapeDtypeStruct(a.shape, a.dtype))(a, b)


# ---------------------------------------------------------------------------
# Conv / pooling / upsample glue (activations stay in flattened-NHWC rows)
# ---------------------------------------------------------------------------
def _im2col(x_nhwc, kh, kw, stride, padding, ch_major):
    """Return patches [N*OH*OW, kh*kw*C] (kk-major) or [.., C*kk] (channel-major).

    TODO(synk): patches are still materialized in HBM before the matmul; a
    kh*kw grid axis with shifted-window index_maps would avoid the copy.
    """
    N, H, W, C = x_nhwc.shape
    if padding:
        x_nhwc = jnp.pad(x_nhwc, ((0, 0), (padding, padding),
                                  (padding, padding), (0, 0)))
    OH = (H + 2 * padding - kh) // stride + 1
    OW = (W + 2 * padding - kw) // stride + 1
    cols = []
    for ih in range(kh):
        for iw in range(kw):
            cols.append(x_nhwc[:, ih:ih + stride * (OH - 1) + 1:stride,
                               iw:iw + stride * (OW - 1) + 1:stride, :])
    p = jnp.stack(cols, axis=4 if ch_major else 3)
    return p.reshape(N * OH * OW, kh * kw * C), (N, OH, OW)


def maxpool_3x3_s2_ceil(rows, shape):
    """MaxPool2d(3, stride=2, ceil_mode=True), pad=0, on rows [N*H*W, C]."""
    N, H, W = shape
    C = rows.shape[1]
    x = rows.reshape(N, H, W, C)
    OH = -((H - 3) // -2) + 1
    OW = -((W - 3) // -2) + 1
    He, We = 2 * (OH - 1) + 3, 2 * (OW - 1) + 3
    x = jnp.pad(x, ((0, 0), (0, He - H), (0, We - W), (0, 0)),
                constant_values=_NEG)
    cols = [x[:, kh:kh + 2 * (OH - 1) + 1:2, kw:kw + 2 * (OW - 1) + 1:2, :]
            for kh in range(3) for kw in range(3)]
    patches = jnp.stack(cols, axis=3).reshape(N * OH * OW, 9, C)
    return window_max(patches), (N, OH, OW)


def bilinear_matrix(in_size, out_size):
    """Interpolation matrix [out_size, in_size], align_corners=True bilinear."""
    A = np.zeros((out_size, in_size), np.float32)
    if out_size == 1 or in_size == 1:
        A[:, 0] = 1.0
        return jnp.asarray(A)
    scale = (in_size - 1) / (out_size - 1)
    for o in range(out_size):
        src = o * scale
        i0 = min(int(np.floor(src)), in_size - 1)
        i1 = min(i0 + 1, in_size - 1)
        w = src - i0
        A[o, i0] += 1.0 - w
        A[o, i1] += w
    return jnp.asarray(A)


def upsample_bilinear_align_corners(x_nchw, out_h, out_w):
    """nn.UpsamplingBilinear2d(size=(out_h, out_w)) (align_corners=True)."""
    N, C, H, W = x_nchw.shape
    Aw, Ah = bilinear_matrix(W, out_w), bilinear_matrix(H, out_h)
    ones_w, zer_w = jnp.ones((out_w,), jnp.float32), jnp.zeros((out_w,), jnp.float32)
    ones_h, zer_h = jnp.ones((out_h,), jnp.float32), jnp.zeros((out_h,), jnp.float32)
    t = matmul_affine(x_nchw.reshape(N * C * H, W), Aw.T, ones_w, zer_w, relu=False)
    t = t.reshape(N, C, H, out_w).transpose(0, 1, 3, 2).reshape(N * C * out_w, H)
    t = matmul_affine(t, Ah.T, ones_h, zer_h, relu=False)
    return t.reshape(N, C, out_w, out_h).transpose(0, 1, 3, 2)


# ---------------------------------------------------------------------------
# SE-ResNeXt50-32x4d parameters (deterministic synthetic init, matmul layouts)
# ---------------------------------------------------------------------------
def pack_grouped(wg, groups=32, lanes=128):
    """Grouped conv weight [width, width/groups, 3, 3] -> [n_packs, 128*9, 128]
    where each pack is block-diagonal over the groups that share its 128 lanes."""
    cout, cpg, KH, KW = wg.shape
    L = min(lanes, cout)
    n_packs = cout // L
    gpp = L // cpg
    w = wg.reshape(n_packs, gpp, cpg, cpg, KH * KW)          # [p, j, oi, ci, kk]
    eye = jnp.eye(gpp, dtype=wg.dtype)
    full = jnp.einsum('pjoik,jq->pjikqo', w, eye)            # [p, j, ci, kk, q, oi]
    return full.reshape(n_packs, L * KH * KW, L).astype(jnp.bfloat16)


def init_params(key, num_class=9):
    # TODO(synk): pretrained se_resnext50_32x4d .pth checkpoint load is replaced
    # by deterministic synthetic initialization (no file I/O).
    counter = [0]

    def nk():
        counter[0] += 1
        return jax.random.fold_in(key, counter[0])

    def conv_w(cout, cin, kh, kw):
        std = float(np.sqrt(2.0 / (cin * kh * kw)))
        return std * jax.random.normal(nk(), (cout, cin, kh, kw), jnp.float32)

    def conv_mat(cout, cin, kh, kw):
        w = conv_w(cout, cin, kh, kw)
        return jnp.transpose(w, (2, 3, 1, 0)).reshape(kh * kw * cin, cout).astype(jnp.bfloat16)

    def bn(c):
        # TODO(synk): BatchNorm uses eval-mode running statistics folded into a
        # per-channel scale/shift; train-mode batch statistics not implemented.
        gamma = 1.0 + 0.1 * jax.random.normal(nk(), (c,), jnp.float32)
        beta = 0.1 * jax.random.normal(nk(), (c,), jnp.float32)
        run_mean = jnp.zeros((c,), jnp.float32)
        run_var = jnp.ones((c,), jnp.float32)
        scale = gamma / jnp.sqrt(run_var + 1e-5)
        shift = beta - run_mean * scale
        return (scale, shift)

    def linear(cin, cout, pad_in=None, pad_out=None):
        std = float(np.sqrt(1.0 / cin))
        w = std * jax.random.normal(nk(), (cin, cout), jnp.float32)
        b = 0.01 * jax.random.normal(nk(), (cout,), jnp.float32)
        pi, po = max(cin, pad_in or 0), max(cout, pad_out or 0)
        w = jnp.pad(w, ((0, pi - cin), (0, po - cout)))
        b = jnp.pad(b, (0, po - cout))
        return w.astype(jnp.bfloat16), b.reshape(1, -1).astype(jnp.float32)

    P = {"layer0_wm": conv_mat(64, 3, 7, 7), "layer0_bn": bn(64),
         "num_class": num_class}
    stages = []
    inplanes = 64
    # (planes, blocks, stride): layer1..layer4 of se_resnext50_32x4d
    for planes, nblocks, stride in ((64, 3, 1), (128, 4, 2), (256, 6, 2), (512, 3, 2)):
        width = planes * 2                       # base_width=4, groups=32
        outc = planes * 4
        cmid = outc // 16                        # SE reduction = 16
        stage = []
        for b in range(nblocks):
            s = stride if b == 0 else 1
            bp = {
                "stride": s,
                "conv1_wm": conv_mat(width, inplanes, 1, 1), "bn1": bn(width),
                "conv2_wp": pack_grouped(conv_w(width, width // 32, 3, 3), 32),
                "bn2": bn(width),
                "conv3_wm": conv_mat(outc, width, 1, 1), "bn3": bn(outc),
            }
            if s != 1 or inplanes != outc:
                bp["down_wm"] = conv_mat(outc, inplanes, 1, 1)
                bp["down_bn"] = bn(outc)
            bp["fc1_w"], bp["fc1_b"] = linear(outc, cmid, pad_out=128)
            bp["fc2_w"], bp["fc2_b"] = linear(cmid, outc, pad_in=128)
            stage.append(bp)
            inplanes = outc
        stages.append(stage)
    P["stages"] = stages
    P["last_w"], P["last_b"] = linear(512 * 4, num_class, pad_out=128)
    return P


# ---------------------------------------------------------------------------
# SE-ResNeXt forward (all heavy math inside Pallas kernels)
# ---------------------------------------------------------------------------
def bottleneck_forward(rows, shape, bp):
    N, H, W = shape
    cin = rows.shape[1]
    width = bp["bn1"][0].shape[0]
    stride = bp["stride"]

    # conv1 1x1 + BN + ReLU (fused epilogue)
    out = matmul_affine(rows, bp["conv1_wm"], bp["bn1"][0], bp["bn1"][1], relu=True)
    # conv2 3x3 grouped (groups=32) + BN + ReLU (packed grouped matmul)
    patches, s2 = _im2col(out.reshape(N, H, W, width), 3, 3, stride, 1, ch_major=True)
    out = grouped_matmul_affine(patches, bp["conv2_wp"],
                                bp["bn2"][0], bp["bn2"][1], relu=True)
    # conv3 1x1 + BN (no ReLU)
    out = matmul_affine(out, bp["conv3_wm"], bp["bn3"][0], bp["bn3"][1], relu=False)
    outc = out.shape[1]

    if "down_wm" in bp:
        if stride == 1:
            xs = rows
        else:
            xs = rows.reshape(N, H, W, cin)[:, ::stride, ::stride, :].reshape(-1, cin)
        res = matmul_affine(xs, bp["down_wm"],
                            bp["down_bn"][0], bp["down_bn"][1], relu=False)
    else:
        res = rows

    n2, oh, ow = s2
    x3d = out.reshape(n2, oh * ow, outc)
    gate = se_head(x3d, bp["fc1_w"], bp["fc1_b"], bp["fc2_w"], bp["fc2_b"])
    y = se_scale_residual_relu(x3d, gate, res.reshape(n2, oh * ow, outc))
    return y.reshape(n2 * oh * ow, outc), s2


def base_model_forward(x_nchw, P):
    # layer0: conv7x7/2 -> BN -> ReLU -> maxpool3x3/2 (ceil)
    x = jnp.transpose(x_nchw, (0, 2, 3, 1)).astype(jnp.bfloat16)       # NHWC once
    patches, shape = _im2col(x, 7, 7, 2, 3, ch_major=False)
    rows = matmul_affine(patches, P["layer0_wm"],
                         P["layer0_bn"][0], P["layer0_bn"][1], relu=True)
    rows, shape = maxpool_3x3_s2_ceil(rows, shape)
    for stage in P["stages"]:
        for bp in stage:
            rows, shape = bottleneck_forward(rows, shape, bp)
    n, h, w = shape
    c = rows.shape[1]
    # TODO(synk): SENet's AvgPool2d(7, stride=1) equals a global average only at
    # the canonical 224x224 input (7x7 final map); implemented as global avg pool.
    logits = gap_linear(rows.reshape(n, h * w, c), P["last_w"], P["last_b"])
    return logits[:, :P["num_class"]]                                   # [N, 9] f32


def multiscale_se_resnext_hr_forward(x_nchw, P):
    # TODO(synk): the two backbone passes could be split across v7x's 2 TensorCores;
    # here they run sequentially on one core.
    input_size = x_nchw.shape[2]
    s2 = int(input_size * 1.25) + 1
    x2 = upsample_bilinear_align_corners(x_nchw, s2, s2)
    y1 = base_model_forward(x_nchw, P)
    y2 = base_model_forward(x2, P)
    return pallas_add(y1, y2)


if __name__ == "__main__":
    root = jax.random.PRNGKey(0)
    params = init_params(jax.random.fold_in(root, 0), num_class=9)
    x = jax.random.normal(jax.random.fold_in(root, 1), (2, 3, 16, 16), jnp.float32)

    out = multiscale_se_resnext_hr_forward(x, params)
    out = jax.block_until_ready(out)

    assert out.shape == (2, 9), out.shape
    assert bool(jnp.all(jnp.isfinite(out)))
    print("KERNEL_OK")
</pallas_src>

<mosaic_0001>
module attributes {stable_mosaic.version = 11 : i64} {
  func.func @_mm_epilogue_kernel(%arg0: i32, %arg1: i32, %arg2: i32, %arg3: memref<96x128xbf16, #tpu.memory_space<vmem>>, %arg4: memref<128x128xbf16, #tpu.memory_space<vmem>>, %arg5: memref<1x128xf32, #tpu.memory_space<vmem>>, %arg6: memref<1x128xf32, #tpu.memory_space<vmem>>, %arg7: memref<96x128xbf16, #tpu.memory_space<vmem>>, %arg8: memref<96x128xf32, #tpu.memory_space<vmem>>) attributes {dimension_semantics = [#tpu.dimension_semantics<parallel>, #tpu.dimension_semantics<parallel>, #tpu.dimension_semantics<arbitrary>], iteration_bounds = array<i64: 1, 1, 1>, scalar_prefetch = 0 : i64, scratch_operands = 1 : i64, tpu.core_type = #tpu.core_type<tc>, window_params = [{transform_indices = @transform_0, window_bounds = array<i64: 96, 128>}, {transform_indices = @transform_1, window_bounds = array<i64: 128, 128>}, {transform_indices = @transform_2, window_bounds = array<i64: 1, 128>}, {transform_indices = @transform_3, window_bounds = array<i64: 1, 128>}, {transform_indices = @transform_4, window_bounds = array<i64: 96, 128>}]} {
    %c0_i32 = arith.constant 0 : i32
    %0 = arith.cmpi eq, %arg2, %c0_i32 : i32
    %1 = arith.extui %0 : i1 to i32
    %c0_i32_0 = arith.constant 0 : i32
    %2 = arith.cmpi ne, %1, %c0_i32_0 : i32
    scf.if %2 {
      %cst_10 = arith.constant 0.000000e+00 : f32
      %12 = vector.broadcast %cst_10 : f32 to vector<96x128xf32>
      %c0_11 = arith.constant 0 : index
      %c0_12 = arith.constant 0 : index
      %13 = vector.load %arg8[%c0_11, %c0_12] : memref<96x128xf32, #tpu.memory_space<vmem>>, vector<96x128xf32>
      tpu.vector_store %arg8[%c0_11, %c0_12], %12 {strides = array<i32>} : memref<96x128xf32, #tpu.memory_space<vmem>>, vector<96x128xf32>,
    } else {
    }
    %c0 = arith.constant 0 : index
    %c0_1 = arith.constant 0 : index
    %3 = vector.load %arg8[%c0, %c0_1] : memref<96x128xf32, #tpu.memory_space<vmem>>, vector<96x128xf32>
    %c0_2 = arith.constant 0 : index
    %c0_3 = arith.constant 0 : index
    %4 = vector.load %arg3[%c0_2, %c0_3] : memref<96x128xbf16, #tpu.memory_space<vmem>>, vector<96x128xbf16>
    %c0_4 = arith.constant 0 : index
    %c0_5 = arith.constant 0 : index
    %5 = vector.load %arg4[%c0_4, %c0_5] : memref<128x128xbf16, #tpu.memory_space<vmem>>, vector<128x128xbf16>
    %cst = arith.constant dense<0.000000e+00> : vector<96x128xf32>
    %6 = tpu.matmul %4, %5, %cst {dimension_numbers = #tpu.dot_dimension_numbers<[1], [0], [0], [1], [0, 0, 1, 1], [], []>} : vector<96x128xbf16>, vector<128x128xbf16>, vector<96x128xf32> -> vector<96x128xf32>
    %7 = arith.addf %3, %6 : vector<96x128xf32>
    %c0_6 = arith.constant 0 : index
    %c0_7 = arith.constant 0 : index
    %8 = vector.load %arg8[%c0_6, %c0_7] : memref<96x128xf32, #tpu.memory_space<vmem>>, vector<96x128xf32>
    tpu.vector_store %arg8[%c0_6, %c0_7], %7 {strides = array<i32>} : memref<96x128xf32, #tpu.memory_space<vmem>>, vector<96x128xf32>,
    %c0_i32_8 = arith.constant 0 : i32
    %9 = arith.cmpi eq, %arg2, %c0_i32_8 : i32
    %10 = arith.extui %9 : i1 to i32
    %c0_i32_9 = arith.constant 0 : i32
    %11 = arith.cmpi ne, %10, %c0_i32_9 : i32
    scf.if %11 {
      %c0_10 = arith.constant 0 : index
      %c0_11 = arith.constant 0 : index
      %12 = vector.load %arg8[%c0_10, %c0_11] : memref<96x128xf32, #tpu.memory_space<vmem>>, vector<96x128xf32>
      %c0_12 = arith.constant 0 : index
      %c0_13 = arith.constant 0 : index
      %13 = vector.load %arg5[%c0_12, %c0_13] : memref<1x128xf32, #tpu.memory_space<vmem>>, vector<1x128xf32>
      %14 = vector.broadcast %13 : vector<1x128xf32> to vector<96x128xf32>
      %15 = arith.mulf %12, %14 : vector<96x128xf32>
      %c0_14 = arith.constant 0 : index
      %c0_15 = arith.constant 0 : index
      %16 = vector.load %arg6[%c0_14, %c0_15] : memref<1x128xf32, #tpu.memory_space<vmem>>, vector<1x128xf32>
      %17 = vector.broadcast %16 : vector<1x128xf32> to vector<96x128xf32>
      %18 = arith.addf %15, %17 : vector<96x128xf32>
      %19 = arith.truncf %18 : vector<96x128xf32> to vector<96x128xbf16>
      %c0_16 = arith.constant 0 : index
      %c0_17 = arith.constant 0 : index
      %20 = vector.load %arg7[%c0_16, %c0_17] : memref<96x128xbf16, #tpu.memory_space<vmem>>, vector<96x128xbf16>
      tpu.vector_store %arg7[%c0_16, %c0_17], %19 {strides = array<i32>} : memref<96x128xbf16, #tpu.memory_space<vmem>>, vector<96x128xbf16>,
    } else {
    }
    return
  }
  func.func @transform_0(%arg0: i32, %arg1: i32, %arg2: i32) -> (i32, i32) {
    %c0_i32 = arith.constant 0 : i32
    return %arg0, %arg2 : i32, i32
  }
  func.func @transform_1(%arg0: i32, %arg1: i32, %arg2: i32) -> (i32, i32) {
    %c0_i32 = arith.constant 0 : i32
    return %arg2, %arg1 : i32, i32
  }
  func.func @transform_2(%arg0: i32, %arg1: i32, %arg2: i32) -> (i32, i32) {
    %c0_i32 = arith.constant 0 : i32
    %c0_i32_0 = arith.constant 0 : i32
    return %c0_i32, %arg1 : i32, i32
  }
  func.func @transform_3(%arg0: i32, %arg1: i32, %arg2: i32) -> (i32, i32) {
    %c0_i32 = arith.constant 0 : i32
    %c0_i32_0 = arith.constant 0 : i32
    return %c0_i32, %arg1 : i32, i32
  }
  func.func @transform_4(%arg0: i32, %arg1: i32, %arg2: i32) -> (i32, i32) {
    %c0_i32 = arith.constant 0 : i32
    return %arg0, %arg1 : i32, i32
  }
}

</mosaic_0001>

<bundles_post_ra>
// kernel: matmul_affine.1
= control target key start
LH: loop header
LB: loop body
LE: loop exit
PB: predicated region body
PF: predicated region fallthrough
CT: control target
= control target key end

     0   :  { %s618_s1 = inlined_call_operand.vmem [shape: bf16[128,128], index: 1, kind: input, shape index: {}]   ;;  %s619_s0 = inlined_call_operand.vmem [shape: bf16[96,128], index: 0, kind: input, shape index: {}]   ;;  %s620_s2 = inlined_call_operand.vmem [shape: f32[1,128], index: 2, kind: input, shape index: {}]   ;;  %s621_s3 = inlined_call_operand.vmem [shape: f32[1,128], index: 3, kind: input, shape index: {}]   ;;  %s622_s4 = inlined_call_operand.vmem [shape: bf16[96,128], index: 4, kind: output, shape index: {}]  }
   0x1   :  { %v513_v0 = vld [vmem:[%s618_s1 + $0x38] sm:$0xff]   ;;  %v514_v1 = vld [vmem:[%s618_s1 + $0x30] sm:$0xff]   ;;  %v515_v2 = vld [vmem:[%s618_s1 + $0x28] sm:$0xff]  }
   0x2   :  { %497 = vmatprep.subr.bf16.mxu1 %v513_v0  ;;  %469 = vmatprep.subr.bf16.mxu0 %v513_v0  ;;  %v516_v3 = vld [vmem:[%s618_s1 + $0x20] sm:$0xff]   ;;  %v521_v4 = vld [vmem:[%s619_s0 + $0x10] sm:$0xff]   ;;  %v517_v6 = vld [vmem:[%s618_s1 + $0x18] sm:$0xff]  }
   0x3   :  { %505 = vmatpush3.bf16.msra.mxu1 %v513_v0  ;;  %470 = vmatpush3.bf16.msra.mxu0 %v513_v0  ;;  %v523_v5 = vld [vmem:[%s619_s0] sm:$0xff]   ;;  %v518_v7 = vld [vmem:[%s618_s1 + $0x10] sm:$0xff]   ;;  %v519_v8 = vld [vmem:[%s618_s1 + $0x8] sm:$0xff]  }
   0x4   :  { %498 = vmatprep.subr.bf16.mxu1 %v514_v1  ;;  %471 = vmatprep.subr.bf16.mxu0 %v514_v1  ;;  %v520_v9 = vld [vmem:[%s618_s1] sm:$0xff]   ;;  %v522_v10 = vld [vmem:[%s619_s0 + $0x18] sm:$0xff]   ;;  %v524_v11 = vld [vmem:[%s619_s0 + $0x8] sm:$0xff]  }
   0x5   :  { %489 = vmatprep.mubr.bf16.mxu1 %v521_v4  ;;  %485 = vmatprep.mubr.bf16.mxu0 %v523_v5  ;;  %v525_v12 = vld [vmem:[%s619_s0 + $0x20] sm:$0xff]   ;;  %v526_v13 = vld [vmem:[%s619_s0 + $0x28] sm:$0xff]  }
   0x6   :  { %v394_v14 = vld [vmem:[%s620_s2] ss:$0 sm:$0xff] }
   0x7   :  { %506 = vmatpush3.bf16.msra.mxu1 %v514_v1  ;;  %472 = vmatpush3.bf16.msra.mxu0 %v514_v1  ;;  %v395_v21 = vld [vmem:[%s621_s3] ss:$0 sm:$0xff] }
   0x8   :  { %499 = vmatprep.subr.bf16.mxu1 %v515_v2  ;;  %473 = vmatprep.subr.bf16.mxu0 %v515_v2 }
   0xb   :  { %507 = vmatpush3.bf16.msra.mxu1 %v515_v2  ;;  %474 = vmatpush3.bf16.msra.mxu0 %v515_v2 }
   0xc   :  { %500 = vmatprep.subr.bf16.mxu1 %v516_v3  ;;  %475 = vmatprep.subr.bf16.mxu0 %v516_v3 }
   0xf   :  { %508 = vmatpush3.bf16.msra.mxu1 %v516_v3  ;;  %476 = vmatpush3.bf16.msra.mxu0 %v516_v3 }
  0x10   :  { %501 = vmatprep.subr.bf16.mxu1 %v517_v6  ;;  %477 = vmatprep.subr.bf16.mxu0 %v517_v6 }
  0x13   :  { %509 = vmatpush3.bf16.msra.mxu1 %v517_v6  ;;  %478 = vmatpush3.bf16.msra.mxu0 %v517_v6 }
  0x14   :  { %502 = vmatprep.subr.bf16.mxu1 %v518_v7  ;;  %479 = vmatprep.subr.bf16.mxu0 %v518_v7 }
  0x17   :  { %510 = vmatpush3.bf16.msra.mxu1 %v518_v7  ;;  %480 = vmatpush3.bf16.msra.mxu0 %v518_v7 }
  0x18   :  { %503 = vmatprep.subr.bf16.mxu1 %v519_v8  ;;  %481 = vmatprep.subr.bf16.mxu0 %v519_v8 }
  0x1b   :  { %511 = vmatpush3.bf16.msra.mxu1 %v519_v8  ;;  %482 = vmatpush3.bf16.msra.mxu0 %v519_v8 }
  0x1c   :  { %504 = vmatprep.subr.bf16.mxu1 %v520_v9  ;;  %483 = vmatprep.subr.bf16.mxu0 %v520_v9 }
  0x1f   :  { %512 = vmatpush3.bf16.msra.mxu1 %v520_v9  ;;  %484 = vmatpush3.bf16.msra.mxu0 %v520_v9 }
  0x22   :  { %490 = vmatmul.mubr.bf16.vlgmr.msra.gmra.mxu1 %v522_v10  ;;  %486 = vmatmul.mubr.bf16.vlgmr.msra.gmra.mxu0 %v524_v11 }
  0x23   :  { %493 = vmatprep.mubr.bf16.mxu1 %v525_v12 }
  0x2a   :  { %494 = vmatmul.mubr.bf16.gmra.mxu1 %v526_v13 }
  0xe2   :  { %v491_v15 = vpop.f32.mrf.mxu1  ;;  %v487_v16 = vpop.f32.mrf.mxu0 }
  0xe3   :  { %v287_v17 = vmul.f32 %v487_v16, %v394_v14  ;;  %v291_v18 = vmul.f32 %v491_v15, %v394_v14 }
  0xe4   :  { %v208_v19 = vpop.f32.mrf.mxu1  ;;  %v192_v20 = vpop.f32.mrf.mxu0 }
  0xe5   :  { %v285_v22 = vmul.f32 %v394_v14, %v192_v20  ;;  %v289_v23 = vmul.f32 %v394_v14, %v208_v19  ;;  %v306_v26 = vadd.f32 %v395_v21, %v287_v17  ;;  %v310_v29 = vadd.f32 %v395_v21, %v291_v18 }
  0xe6   :  { %v492_v24 = vpop.f32.mrf.mxu1  ;;  %v488_v25 = vpop.f32.mrf.mxu0 }
  0xe7   :  { %v292_v27 = vmul.f32 %v492_v24, %v394_v14  ;;  %v288_v28 = vmul.f32 %v488_v25, %v394_v14  ;;  %v304_v30 = vadd.f32 %v395_v21, %v285_v22  ;;  %v308_v37 = vadd.f32 %v395_v21, %v289_v23 }
  0xe8   :  { %v211_v31 = vpop.f32.mrf.mxu1  ;;  %v195_v32 = vpop.f32.mrf.mxu0 }
  0xe9   :  { %v311_v33 = vadd.f32 %v395_v21, %v292_v27  ;;  %v307_v34 = vadd.f32 %v395_v21, %v288_v28  ;;  %v290_v35 = vmul.f32 %v394_v14, %v211_v31  ;;  %v286_v36 = vmul.f32 %v394_v14, %v195_v32 }
  0xea   :  { %v495_v38 = vpop.f32.mrf.mxu1 }
  0xeb   :  { %v438_v39 = vpack.c.bf16 %v311_v33, %v310_v29  ;;  %v428_v40 = vpack.c.bf16 %v307_v34, %v306_v26  ;;  %v309_v41 = vadd.f32 %v395_v21, %v290_v35  ;;  %v305_v42 = vadd.f32 %v395_v21, %v286_v36 }
  0xec   :  { %v224_v43 = vpop.f32.mrf.mxu1  ;;  %v295_v46 = vmul.f32 %v495_v38, %v394_v14 }
  0xed   :  { %452 = vst [vmem:[%s622_s4 + $0x18] sm:$0xff] %v438_v39   ;;  %450 = vst [vmem:[%s622_s4 + $0x8] sm:$0xff] %v428_v40   ;;  %v433_v44 = vpack.c.bf16 %v309_v41, %v308_v37  ;;  %v423_v45 = vpack.c.bf16 %v305_v42, %v304_v30  ;;  %v293_v48 = vmul.f32 %v394_v14, %v224_v43 }
  0xee   :  { %v496_v47 = vpop.f32.mrf.mxu1  ;;  %v314_v51 = vadd.f32 %v395_v21, %v295_v46 }
  0xef   :  { %451 = vst [vmem:[%s622_s4 + $0x10] sm:$0xff] %v433_v44   ;;  %424 = vst [vmem:[%s622_s4] sm:$0xff] %v423_v45   ;;  %v296_v49 = vmul.f32 %v496_v47, %v394_v14  ;;  %v312_v54 = vadd.f32 %v395_v21, %v293_v48 }
  0xf0   :  { %v227_v50 = vpop.f32.mrf.mxu1 }
  0xf1   :  { %v315_v52 = vadd.f32 %v395_v21, %v296_v49  ;;  %v294_v53 = vmul.f32 %v394_v14, %v227_v50 }
  0xf3   :  { %v448_v55 = vpack.c.bf16 %v315_v52, %v314_v51  ;;  %v313_v56 = vadd.f32 %v395_v21, %v294_v53 }
  0xf5   :  { %454 = vst [vmem:[%s622_s4 + $0x28] sm:$0xff] %v448_v55   ;;  %v443_v57 = vpack.c.bf16 %v313_v56, %v312_v54 }
  0xf7   :  { %453 = vst [vmem:[%s622_s4 + $0x20] sm:$0xff] %v443_v57  }

</bundles_post_ra>
